<compile_context>
chip_gen: v6e
topology: v6e:2x2x1
jax: 0.10.0
libtpu: 0.0.40
codegen_flags: <defaults>
</compile_context>

<pallas_src>
import jax
import jax.numpy as jnp
import numpy as np
from jax.experimental import pallas as pl
from jax.experimental.pallas import tpu as pltpu


def _round_up(x, m):
    return ((x + m - 1) // m) * m


# ----------------------------------------------------------------------------
# Kernel: pure 4-matmul chain on lane-dense operands (both Q heads fused).
# ----------------------------------------------------------------------------
def _critic_kernel(x_ref, convm_ref, w1_ref, w2_ref, w3_ref, bias_ref, out_ref):
    CO = convm_ref.shape[1]
    HP = w1_ref.shape[1]
    QO = w3_ref.shape[1]
    wdt = w1_ref.dtype

    x = x_ref[...].astype(wdt)                        # (TB, P) = [state_flat | action | 0]

    # Conv1d(k=1) over the stack axis + repeated-action term, as one matmul.
    h = jnp.dot(x, convm_ref[...], preferred_element_type=jnp.float32)
    h = jnp.maximum(h + bias_ref[0:1, :CO], 0.0)      # ReLU after conv (see module TODO)

    h = jnp.dot(h.astype(wdt), w1_ref[...], preferred_element_type=jnp.float32)
    h = jnp.maximum(h + bias_ref[1:2, :HP], 0.0)

    h = jnp.dot(h.astype(wdt), w2_ref[...], preferred_element_type=jnp.float32)
    h = jnp.maximum(h + bias_ref[2:3, :HP], 0.0)

    q = jnp.dot(h.astype(wdt), w3_ref[...], preferred_element_type=jnp.float32)
    out_ref[...] = (q + bias_ref[3:4, :QO]).astype(out_ref.dtype)   # lanes 0/1 = q1/q2


# ----------------------------------------------------------------------------
# Wrapper: lane-dense packing, batch-tiled parallel grid, q1/q2 split outside.
# ----------------------------------------------------------------------------
def _pick_batch_tile(B, cap=512):
    if B <= cap:
        return B                       # single full-batch tile, no padding
    for t in (512, 384, 256, 128, 64, 32, 16, 8):
        if B % t == 0:
            return t                   # divides B -> no wrapper-side batch pad
    return cap                         # rare fallback: pad the batch


@jax.jit
def critic_forward(state, action, fused_params):
    """state: (B, S, Fs) f32, action: (B, A) f32 -> (q1, q2), each (B, 1) f32."""
    convm, w1f, w2f, w3f, biasf = fused_params
    B, S, Fs = state.shape
    A = action.shape[-1]
    P = convm.shape[0]
    QO = w3f.shape[1]
    IN = S * Fs + A

    # Lane-dense packed activations: [state_flat | action | zero-pad] -> (B, P).
    x = jnp.concatenate(
        [state.reshape(B, S * Fs).astype(jnp.float32),
         action.astype(jnp.float32)], axis=-1)
    if P != IN:
        x = jnp.pad(x, ((0, 0), (0, P - IN)))

    TB = _pick_batch_tile(B)
    Bp = pl.cdiv(B, TB) * TB
    if Bp != B:
        x = jnp.pad(x, ((0, Bp - B), (0, 0)))

    out = pl.pallas_call(
        _critic_kernel,
        grid=(Bp // TB,),
        in_specs=[
            pl.BlockSpec((TB, P), lambda i: (i, 0)),       # packed activations tile
            pl.BlockSpec(convm.shape, lambda i: (0, 0)),   # conv-as-matmul matrix
            pl.BlockSpec(w1f.shape, lambda i: (0, 0)),     # fused block-diag W1
            pl.BlockSpec(w2f.shape, lambda i: (0, 0)),     # fused block-diag W2
            pl.BlockSpec(w3f.shape, lambda i: (0, 0)),     # fused W3 (lane-dense out)
            pl.BlockSpec(biasf.shape, lambda i: (0, 0)),   # fused biases (4, BW)
        ],
        out_specs=pl.BlockSpec((TB, QO), lambda i: (i, 0)),
        out_shape=jax.ShapeDtypeStruct((Bp, QO), jnp.float32),
        compiler_params=pltpu.CompilerParams(
            dimension_semantics=("parallel",)),            # shards batch tiles over TCs
    )(x, convm, w1f, w2f, w3f, biasf)

    return out[:B, 0:1], out[:B, 1:2]


# ----------------------------------------------------------------------------
# Parameter init (mirrors the PyTorch module shapes) + head fusion.
# ----------------------------------------------------------------------------
def _init_linear(key, fan_in, fan_out):
    kw, kb = jax.random.split(key)
    bound = 1.0 / np.sqrt(fan_in)
    w = jax.random.uniform(kw, (fan_in, fan_out), jnp.float32, -bound, bound)
    b = jax.random.uniform(kb, (1, fan_out), jnp.float32, -bound, bound)
    return w, b


def init_critic_params(key, stack, feat_sa, hidden):
    """Per Q head: Conv1d(stack->1, k=1), Linear(F->H), Linear(H->H), Linear(H->1)."""
    def one_head(k):
        k0, k1, k2, k3 = jax.random.split(k, 4)
        cb_bound = 1.0 / np.sqrt(stack)
        cw = jax.random.uniform(k0, (1, stack, 1), jnp.float32, -cb_bound, cb_bound)
        cb = jax.random.uniform(jax.random.fold_in(k0, 1), (1, 1), jnp.float32,
                                -cb_bound, cb_bound)
        w1, b1 = _init_linear(k1, feat_sa, hidden)
        w2, b2 = _init_linear(k2, hidden, hidden)
        w3, b3 = _init_linear(k3, hidden, 1)
        return (cw, cb, w1, b1, w2, b2, w3, b3)

    kq1, kq2 = jax.random.split(key)
    return one_head(kq1) + one_head(kq2)


def fuse_critic_params(params, stack, feat_state, action_dim,
                       weight_dtype=jnp.float32):
    """Build the fused lane-dense operands. Done once, outside the hot path.

    weight_dtype=jnp.bfloat16 is recommended on v5e/v6e (native MXU input)."""
    (cw1, cb1, w11, b11, w12, b12, w13, b13,
     cw2, cb2, w21, b21, w22, b22, w23, b23) = [np.asarray(p, np.float32) for p in params]
    S, Fs, A = stack, feat_state, action_dim
    F, H = w11.shape                       # F = Fs + A
    assert F == Fs + A

    IN = S * Fs + A
    P = _round_up(IN, 128)                 # packed input width (lane-dense)
    CO = _round_up(2 * F, 128)             # fused conv-output width
    HP = _round_up(2 * H, 128)             # fused hidden width
    QO = 128                               # lane-dense output; only lanes 0/1 used
    BW = max(CO, HP, QO)

    convm = np.zeros((P, CO), np.float32)
    w1f = np.zeros((CO, HP), np.float32)
    w2f = np.zeros((HP, HP), np.float32)
    w3f = np.zeros((HP, QO), np.float32)
    biasf = np.zeros((4, BW), np.float32)

    heads = [(cw1, cb1, w11, b11, w12, b12, w13, b13),
             (cw2, cb2, w21, b21, w22, b22, w23, b23)]
    for h, (cw, cb, w1, b1, w2, b2, w3, b3) in enumerate(heads):
        cw_s = cw.reshape(S)
        off = h * F
        # State part: out[f] = sum_s cw[s] * state[s, f]
        for s in range(S):
            convm[s * Fs:(s + 1) * Fs, off:off + Fs] += \
                np.eye(Fs, dtype=np.float32) * cw_s[s]
        # Action part: repeated action sums to action * sum_s(cw[s])
        convm[S * Fs:S * Fs + A, off + Fs:off + F] = \
            np.eye(A, dtype=np.float32) * float(cw_s.sum())
        biasf[0, off:off + F] = float(cb.reshape(()))

        w1f[off:off + F, h * H:(h + 1) * H] = w1
        biasf[1, h * H:(h + 1) * H] = b1[0]
        w2f[h * H:(h + 1) * H, h * H:(h + 1) * H] = w2
        biasf[2, h * H:(h + 1) * H] = b2[0]
        w3f[h * H:(h + 1) * H, h] = w3[:, 0]
        biasf[3, h] = b3[0, 0]

    wdt = weight_dtype
    return (jnp.asarray(convm, wdt), jnp.asarray(w1f, wdt), jnp.asarray(w2f, wdt),
            jnp.asarray(w3f, wdt), jnp.asarray(biasf, jnp.float32))


# ----------------------------------------------------------------------------
# Pure-JAX reference (original, unfused semantics) for correctness check.
# ----------------------------------------------------------------------------
def _reference(state, action, params):
    B, S, _ = state.shape
    A = action.shape[-1]
    sa = jnp.concatenate(
        [state, jnp.broadcast_to(action[:, None, :], (B, S, A))], axis=-1)

    def qnet(p):
        cw, cb, w1, b1, w2, b2, w3, b3 = p
        h = jnp.maximum(jnp.sum(sa * cw, axis=1) + cb, 0.0)
        h = jnp.maximum(h @ w1 + b1, 0.0)
        h = jnp.maximum(h @ w2 + b2, 0.0)
        return h @ w3 + b3

    return qnet(params[:8]), qnet(params[8:])


if __name__ == "__main__":
    # Small shapes consistent with the module (stacked state observations).
    B, S, Fs, A, H = 8, 4, 20, 4, 32   # batch, stack, state feats, action dim, hidden
    F = Fs + A

    key = jax.random.PRNGKey(0)
    k_state, k_action, k_params = jax.random.split(key, 3)
    state = jax.random.normal(k_state, (B, S, Fs), jnp.float32)
    action = jax.random.uniform(k_action, (B, A), jnp.float32, -1.0, 1.0)

    params = init_critic_params(k_params, S, F, H)
    # f32 weights for the tight demo check; pass weight_dtype=jnp.bfloat16 on v5e/v6e.
    fused = fuse_critic_params(params, S, Fs, A, weight_dtype=jnp.float32)

    q1, q2 = critic_forward(state, action, fused)
    jax.block_until_ready((q1, q2))

    r1, r2 = _reference(state, action, params)
    assert q1.shape == (B, 1) and q2.shape == (B, 1)
    np.testing.assert_allclose(np.asarray(q1), np.asarray(r1), rtol=1e-4, atol=1e-5)
    np.testing.assert_allclose(np.asarray(q2), np.asarray(r2), rtol=1e-4, atol=1e-5)

    print("KERNEL_OK")
</pallas_src>

<mosaic_0001>
module attributes {stable_mosaic.version = 11 : i64} {
  func.func @_critic_kernel(%arg0: i32, %arg1: memref<8x128xf32, #tpu.memory_space<vmem>>, %arg2: memref<128x128xf32, #tpu.memory_space<vmem>>, %arg3: memref<128x128xf32, #tpu.memory_space<vmem>>, %arg4: memref<128x128xf32, #tpu.memory_space<vmem>>, %arg5: memref<128x128xf32, #tpu.memory_space<vmem>>, %arg6: memref<4x128xf32, #tpu.memory_space<vmem>>, %arg7: memref<8x128xf32, #tpu.memory_space<vmem>>) attributes {dimension_semantics = [#tpu.dimension_semantics<parallel>], iteration_bounds = array<i64: 1>, scalar_prefetch = 0 : i64, scratch_operands = 0 : i64, tpu.core_type = #tpu.core_type<tc>, window_params = [{transform_indices = @transform_0, window_bounds = array<i64: 8, 128>}, {pipeline_mode = #tpu.pipeline_mode<synchronous>, transform_indices = @transform_1, window_bounds = array<i64: 128, 128>}, {pipeline_mode = #tpu.pipeline_mode<synchronous>, transform_indices = @transform_2, window_bounds = array<i64: 128, 128>}, {pipeline_mode = #tpu.pipeline_mode<synchronous>, transform_indices = @transform_3, window_bounds = array<i64: 128, 128>}, {pipeline_mode = #tpu.pipeline_mode<synchronous>, transform_indices = @transform_4, window_bounds = array<i64: 128, 128>}, {pipeline_mode = #tpu.pipeline_mode<synchronous>, transform_indices = @transform_5, window_bounds = array<i64: 4, 128>}, {transform_indices = @transform_6, window_bounds = array<i64: 8, 128>}]} {
    %c0 = arith.constant 0 : index
    %c0_0 = arith.constant 0 : index
    %0 = vector.load %arg1[%c0, %c0_0] : memref<8x128xf32, #tpu.memory_space<vmem>>, vector<8x128xf32>
    %c0_1 = arith.constant 0 : index
    %c0_2 = arith.constant 0 : index
    %1 = vector.load %arg2[%c0_1, %c0_2] : memref<128x128xf32, #tpu.memory_space<vmem>>, vector<128x128xf32>
    %cst = arith.constant dense<0.000000e+00> : vector<8x128xf32>
    %2 = tpu.matmul %0, %1, %cst {dimension_numbers = #tpu.dot_dimension_numbers<[1], [0], [0], [1], [0, 0, 1, 1], [], []>} : vector<8x128xf32>, vector<128x128xf32>, vector<8x128xf32> -> vector<8x128xf32>
    %c0_3 = arith.constant 0 : index
    %c0_4 = arith.constant 0 : index
    %3 = vector.load %arg6[%c0_3, %c0_4] : memref<4x128xf32, #tpu.memory_space<vmem>>, vector<1x128xf32>
    %4 = vector.broadcast %3 : vector<1x128xf32> to vector<8x128xf32>
    %5 = arith.addf %2, %4 : vector<8x128xf32>
    %cst_5 = arith.constant 0.000000e+00 : f32
    %6 = vector.broadcast %cst_5 : f32 to vector<8x128xf32>
    %7 = arith.maximumf %5, %6 : vector<8x128xf32>
    %c0_6 = arith.constant 0 : index
    %c0_7 = arith.constant 0 : index
    %8 = vector.load %arg3[%c0_6, %c0_7] : memref<128x128xf32, #tpu.memory_space<vmem>>, vector<128x128xf32>
    %cst_8 = arith.constant dense<0.000000e+00> : vector<8x128xf32>
    %9 = tpu.matmul %7, %8, %cst_8 {dimension_numbers = #tpu.dot_dimension_numbers<[1], [0], [0], [1], [0, 0, 1, 1], [], []>} : vector<8x128xf32>, vector<128x128xf32>, vector<8x128xf32> -> vector<8x128xf32>
    %c1 = arith.constant 1 : index
    %c0_9 = arith.constant 0 : index
    %10 = vector.load %arg6[%c1, %c0_9] : memref<4x128xf32, #tpu.memory_space<vmem>>, vector<1x128xf32>
    %11 = vector.broadcast %10 : vector<1x128xf32> to vector<8x128xf32>
    %12 = arith.addf %9, %11 : vector<8x128xf32>
    %cst_10 = arith.constant 0.000000e+00 : f32
    %13 = vector.broadcast %cst_10 : f32 to vector<8x128xf32>
    %14 = arith.maximumf %12, %13 : vector<8x128xf32>
    %c0_11 = arith.constant 0 : index
    %c0_12 = arith.constant 0 : index
    %15 = vector.load %arg4[%c0_11, %c0_12] : memref<128x128xf32, #tpu.memory_space<vmem>>, vector<128x128xf32>
    %cst_13 = arith.constant dense<0.000000e+00> : vector<8x128xf32>
    %16 = tpu.matmul %14, %15, %cst_13 {dimension_numbers = #tpu.dot_dimension_numbers<[1], [0], [0], [1], [0, 0, 1, 1], [], []>} : vector<8x128xf32>, vector<128x128xf32>, vector<8x128xf32> -> vector<8x128xf32>
    %c2 = arith.constant 2 : index
    %c0_14 = arith.constant 0 : index
    %17 = vector.load %arg6[%c2, %c0_14] : memref<4x128xf32, #tpu.memory_space<vmem>>, vector<1x128xf32>
    %18 = vector.broadcast %17 : vector<1x128xf32> to vector<8x128xf32>
    %19 = arith.addf %16, %18 : vector<8x128xf32>
    %cst_15 = arith.constant 0.000000e+00 : f32
    %20 = vector.broadcast %cst_15 : f32 to vector<8x128xf32>
    %21 = arith.maximumf %19, %20 : vector<8x128xf32>
    %c0_16 = arith.constant 0 : index
    %c0_17 = arith.constant 0 : index
    %22 = vector.load %arg5[%c0_16, %c0_17] : memref<128x128xf32, #tpu.memory_space<vmem>>, vector<128x128xf32>
    %cst_18 = arith.constant dense<0.000000e+00> : vector<8x128xf32>
    %23 = tpu.matmul %21, %22, %cst_18 {dimension_numbers = #tpu.dot_dimension_numbers<[1], [0], [0], [1], [0, 0, 1, 1], [], []>} : vector<8x128xf32>, vector<128x128xf32>, vector<8x128xf32> -> vector<8x128xf32>
    %c3 = arith.constant 3 : index
    %c0_19 = arith.constant 0 : index
    %24 = vector.load %arg6[%c3, %c0_19] : memref<4x128xf32, #tpu.memory_space<vmem>>, vector<1x128xf32>
    %25 = vector.broadcast %24 : vector<1x128xf32> to vector<8x128xf32>
    %26 = arith.addf %23, %25 : vector<8x128xf32>
    %c0_20 = arith.constant 0 : index
    %c0_21 = arith.constant 0 : index
    %27 = vector.load %arg7[%c0_20, %c0_21] : memref<8x128xf32, #tpu.memory_space<vmem>>, vector<8x128xf32>
    tpu.vector_store %arg7[%c0_20, %c0_21], %26 {strides = array<i32>} : memref<8x128xf32, #tpu.memory_space<vmem>>, vector<8x128xf32>,
    return
  }
  func.func @transform_0(%arg0: i32) -> (i32, i32) {
    %c0_i32 = arith.constant 0 : i32
    %c0_i32_0 = arith.constant 0 : i32
    return %arg0, %c0_i32 : i32, i32
  }
  func.func @transform_1(%arg0: i32) -> (i32, i32) {
    %c0_i32 = arith.constant 0 : i32
    %c0_i32_0 = arith.constant 0 : i32
    %c0_i32_1 = arith.constant 0 : i32
    return %c0_i32, %c0_i32_0 : i32, i32
  }
  func.func @transform_2(%arg0: i32) -> (i32, i32) {
    %c0_i32 = arith.constant 0 : i32
    %c0_i32_0 = arith.constant 0 : i32
    %c0_i32_1 = arith.constant 0 : i32
    return %c0_i32, %c0_i32_0 : i32, i32
  }
  func.func @transform_3(%arg0: i32) -> (i32, i32) {
    %c0_i32 = arith.constant 0 : i32
    %c0_i32_0 = arith.constant 0 : i32
    %c0_i32_1 = arith.constant 0 : i32
    return %c0_i32, %c0_i32_0 : i32, i32
  }
  func.func @transform_4(%arg0: i32) -> (i32, i32) {
    %c0_i32 = arith.constant 0 : i32
    %c0_i32_0 = arith.constant 0 : i32
    %c0_i32_1 = arith.constant 0 : i32
    return %c0_i32, %c0_i32_0 : i32, i32
  }
  func.func @transform_5(%arg0: i32) -> (i32, i32) {
    %c0_i32 = arith.constant 0 : i32
    %c0_i32_0 = arith.constant 0 : i32
    %c0_i32_1 = arith.constant 0 : i32
    return %c0_i32, %c0_i32_0 : i32, i32
  }
  func.func @transform_6(%arg0: i32) -> (i32, i32) {
    %c0_i32 = arith.constant 0 : i32
    %c0_i32_0 = arith.constant 0 : i32
    return %arg0, %c0_i32 : i32, i32
  }
}

</mosaic_0001>

<bundles_post_ra>
// kernel: critic_forward.1
= control target key start
LH: loop header
LB: loop body
LE: loop exit
PB: predicated region body
PF: predicated region fallthrough
CT: control target
= control target key end

     0   :  { %11 = vsyncpa [#allocation3], 0  ;;  %s917_s0 = inlined_call_operand.vmem [shape: f32[8,128], index: 0, kind: input, shape index: {}]   ;;  %s918_s1 = inlined_call_operand.hbm [shape: f32[128,128], index: 1, kind: input, shape index: {}]   ;;  %s919_s2 = inlined_call_operand.hbm [shape: f32[128,128], index: 2, kind: input, shape index: {}]   ;;  %s920_s3 = inlined_call_operand.hbm [shape: f32[128,128], index: 3, kind: input, shape index: {}]   ;;  %s921_s4 = inlined_call_operand.hbm [shape: f32[128,128], index: 4, kind: input, shape index: {}]   ;;  %s922_s5 = inlined_call_operand.vmem [shape: f32[4,128], index: 5, kind: input, shape index: {}]   ;;  %s923_s6 = inlined_call_operand.vmem [shape: f32[8,128], index: 6, kind: output, shape index: {}]  }
   0x1   :  { %12 = vsyncpa [#allocation5], 0 }
   0x2   :  { %13 = vsyncpa [#allocation8], 0  ;;  %s760_s21 = smov [#allocation4]   ;;  %s761_s23 = smov [#allocation2]  }
   0x3   :  { %s33_s22 = sshll.u32 %s760_s21, 4  ;;  %s21_s24 = sshll.u32 %s761_s23, 4  ;;  %s34_s22 = int_to_ptr.vmem [resolvable:$true] %s33_s22  ;;  %s22_s24 = int_to_ptr.vmem [resolvable:$true] %s21_s24 }
   0x4   :  { %s682_s25 = scalar_lea.vmem %s34_s22, 2048  ;;  %p687_p1 = scmp.lt.s32.totalorder %s34_s22, %s34_s22 }
   0x5   :  { %p683_p0 = scmp.ne.s32.totalorder %s34_s22, %s682_s25  ;;  %p688_p2 = scmp.lt.s32.totalorder %s682_s25, %s682_s25 }
   0x7   :  { %p689_p3 = por %p688_p2, %p687_p1 }
   0x9   :  { %p690_p4 = pnand %p689_p3, %p683_p0 }
   0xb   :  { %693 = shalt.err (!%p690_p4)
}
   0xc   :  { %s762_s26 = smov 128   ;;  %s763_s27 = smov 8  }
   0xd   :  { %39 = dma.hbm_to_vmem [thread:$0]  %s919_s2, 2048, %s34_s22, [#allocation5], %s762_s26, %s762_s26, %s763_s27  }
   0xe   :  { %s702_s30 = scalar_lea.vmem %s22_s24, 2048  ;;  %p707_p6 = scmp.lt.s32.totalorder %s22_s24, %s22_s24 }
   0xf   :  { %p703_p5 = scmp.ne.s32.totalorder %s22_s24, %s702_s30  ;;  %p708_p7 = scmp.lt.s32.totalorder %s702_s30, %s702_s30 }
  0x11   :  { %p709_p8 = por %p708_p7, %p707_p6 }
  0x13   :  { %p710_p9 = pnand %p709_p8, %p703_p5 }
  0x15   :  { %713 = shalt.err (!%p710_p9)
}
  0x16   :  { %27 = dma.hbm_to_vmem [thread:$0]  %s918_s1, 2048, %s22_s24, [#allocation3], %s762_s26, %s762_s26, %s763_s27  }
  0x17   :  { %s764_s9 = smov [#allocation6]   ;;  %s765_s11 = smov [#allocation7]  }
  0x18   :  { %s45_s10 = sshll.u32 %s764_s9, 4  ;;  %s57_s12 = sshll.u32 %s765_s11, 4  ;;  %s46_s10 = int_to_ptr.vmem [resolvable:$true] %s45_s10  ;;  %s58_s12 = int_to_ptr.vmem [resolvable:$true] %s57_s12 }
  0x19   :  { %s722_s2 = scalar_lea.vmem %s46_s10, 2048  ;;  %p727_p11 = scmp.lt.s32.totalorder %s46_s10, %s46_s10 }
  0x1a   :  { %p723_p10 = scmp.ne.s32.totalorder %s46_s10, %s722_s2  ;;  %p728_p12 = scmp.lt.s32.totalorder %s722_s2, %s722_s2 }
  0x1c   :  { %p729_p13 = por %p728_p12, %p727_p11 }
  0x1e   :  { %p730_p0 = pnand %p729_p13, %p723_p10 }
  0x20   :  { %733 = shalt.err (!%p730_p0)
}
  0x21   :  { %51 = dma.hbm_to_vmem [thread:$0]  %s920_s3, 2048, %s46_s10, [#allocation5], %s762_s26, %s762_s26, %s763_s27  }
  0x22   :  { %s742_s1 = scalar_lea.vmem %s58_s12, 2048  ;;  %p747_p2 = scmp.lt.s32.totalorder %s58_s12, %s58_s12 }
  0x23   :  { %p743_p1 = scmp.ne.s32.totalorder %s58_s12, %s742_s1  ;;  %p748_p3 = scmp.lt.s32.totalorder %s742_s1, %s742_s1 }
  0x25   :  { %p749_p4 = por %p748_p3, %p747_p2 }
  0x27   :  { %p750_p5 = pnand %p749_p4, %p743_p1 }
  0x29   :  { %753 = shalt.err (!%p750_p5)
}
  0x2a   :  { %63 = dma.hbm_to_vmem [thread:$0]  %s921_s4, 2048, %s58_s12, [#allocation8], %s762_s26, %s762_s26, %s763_s27  }
  0x2b   :  { %754 = dma.done.wait [#allocation3], 2048  }
  0x2c   :  { %755 = vsyncadd [#allocation3], 4294965248 }
  0x2d   :  { %756 = dma.done.wait [#allocation5], 4096  }
  0x2e   :  { %757 = vsyncadd [#allocation5], 4294963200 }
  0x2f   :  { %758 = dma.done.wait [#allocation8], 2048  }
  0x30   :  { %759 = vsyncadd [#allocation8], 4294965248  ;;  %v766_v0 = vmov 0.0   ;;  %vm767_vm0 = vmmov 0   ;;  %v94_v1 = vld [vmem:[#allocation2 + $0x78] sm:$0xff]  ;;  %v93_v2 = vld [vmem:[#allocation2 + $0x70] sm:$0xff] }
  0x31   :  { %526 = vmatprep.subr.mxu0 %v766_v0  ;;  %558 = vmatprep.mubr.msk.f32.mxu0 %vm767_vm0, %v766_v0  ;;  %v92_v3 = vld [vmem:[#allocation2 + $0x68] sm:$0xff]  ;;  %v91_v4 = vld [vmem:[#allocation2 + $0x60] sm:$0xff]  ;;  %v186_v5 = vld [vmem:[#allocation4 + $0x78] sm:$0xff] }
  0x32   :  { %561 = vmatprep.subr.mxu1 %v766_v0  ;;  %593 = vmatprep.mubr.msk.f32.mxu1 %vm767_vm0, %v766_v0  ;;  %v90_v6 = vld [vmem:[#allocation2 + $0x58] sm:$0xff]  ;;  %v185_v7 = vld [vmem:[#allocation4 + $0x70] sm:$0xff]  ;;  %v184_v8 = vld [vmem:[#allocation4 + $0x68] sm:$0xff] }
  0x33   :  { %527 = vmatpush3.msra.mxu0 %v94_v1  ;;  %562 = vmatpush3.msra.mxu1 %v186_v5  ;;  %v89_v9 = vld [vmem:[#allocation2 + $0x50] sm:$0xff]  ;;  %v183_v10 = vld [vmem:[#allocation4 + $0x60] sm:$0xff]  ;;  %v88_v11 = vld [vmem:[#allocation2 + $0x48] sm:$0xff] }
  0x34   :  { %528 = vmatprep.subr.mxu0 %v766_v0  ;;  %563 = vmatprep.subr.mxu1 %v766_v0  ;;  %v182_v12 = vld [vmem:[#allocation4 + $0x58] sm:$0xff]  ;;  %v87_v13 = vld [vmem:[#allocation2 + $0x40] sm:$0xff]  ;;  %v181_v14 = vld [vmem:[#allocation4 + $0x50] sm:$0xff] }
  0x35   :  { %529 = vmatpush3.msra.mxu0 %v93_v2  ;;  %564 = vmatpush3.msra.mxu1 %v185_v7  ;;  %v86_v15 = vld [vmem:[#allocation2 + $0x38] sm:$0xff]  ;;  %v180_v16 = vld [vmem:[#allocation4 + $0x48] sm:$0xff]  ;;  %v85_v17 = vld [vmem:[#allocation2 + $0x30] sm:$0xff] }
  0x36   :  { %530 = vmatprep.subr.mxu0 %v766_v0  ;;  %565 = vmatprep.subr.mxu1 %v766_v0  ;;  %v179_v18 = vld [vmem:[#allocation4 + $0x40] sm:$0xff]  ;;  %v84_v19 = vld [vmem:[#allocation2 + $0x28] sm:$0xff]  ;;  %v178_v20 = vld [vmem:[#allocation4 + $0x38] sm:$0xff] }
  0x37   :  { %531 = vmatpush3.msra.mxu0 %v92_v3  ;;  %566 = vmatpush3.msra.mxu1 %v184_v8  ;;  %v83_v21 = vld [vmem:[#allocation2 + $0x20] sm:$0xff]  ;;  %v177_v22 = vld [vmem:[#allocation4 + $0x30] sm:$0xff]  ;;  %v82_v23 = vld [vmem:[#allocation2 + $0x18] sm:$0xff] }
  0x38   :  { %532 = vmatprep.subr.mxu0 %v766_v0  ;;  %567 = vmatprep.subr.mxu1 %v766_v0  ;;  %v176_v24 = vld [vmem:[#allocation4 + $0x28] sm:$0xff]  ;;  %v81_v25 = vld [vmem:[#allocation2 + $0x10] sm:$0xff]  ;;  %v175_v26 = vld [vmem:[#allocation4 + $0x20] sm:$0xff] }
  0x39   :  { %533 = vmatpush3.msra.mxu0 %v91_v4  ;;  %568 = vmatpush3.msra.mxu1 %v183_v10  ;;  %v80_v27 = vld [vmem:[#allocation2 + $0x8] sm:$0xff]  ;;  %v174_v28 = vld [vmem:[#allocation4 + $0x18] sm:$0xff]  ;;  %v79_v29 = vld [vmem:[#allocation2] sm:$0xff] }
  0x3a   :  { %534 = vmatprep.subr.mxu0 %v766_v0  ;;  %569 = vmatprep.subr.mxu1 %v766_v0  ;;  %v78_v30 = vld [vmem:[%s917_s0] sm:$0xff]  ;;  %v173_v31 = vld [vmem:[#allocation4 + $0x10] sm:$0xff]  ;;  %v172_v32 = vld [vmem:[#allocation4 + $0x8] sm:$0xff] }
  0x3b   :  { %535 = vmatpush3.msra.mxu0 %v90_v6  ;;  %570 = vmatpush3.msra.mxu1 %v182_v12  ;;  %v171_v33 = vld [vmem:[#allocation4] sm:$0xff]  ;;  %v278_v34 = vld [vmem:[#allocation6 + $0x78] sm:$0xff]  ;;  %v277_v35 = vld [vmem:[#allocation6 + $0x70] sm:$0xff] }
  0x3c   :  { %536 = vmatprep.subr.mxu0 %v766_v0  ;;  %571 = vmatprep.subr.mxu1 %v766_v0  ;;  %v276_v36 = vld [vmem:[#allocation6 + $0x68] sm:$0xff]  ;;  %v275_v37 = vld [vmem:[#allocation6 + $0x60] sm:$0xff]  ;;  %v274_v38 = vld [vmem:[#allocation6 + $0x58] sm:$0xff] }
  0x3d   :  { %537 = vmatpush3.msra.mxu0 %v89_v9  ;;  %572 = vmatpush3.msra.mxu1 %v181_v14  ;;  %v273_v39 = vld [vmem:[#allocation6 + $0x50] sm:$0xff]  ;;  %v272_v40 = vld [vmem:[#allocation6 + $0x48] sm:$0xff]  ;;  %v271_v41 = vld [vmem:[#allocation6 + $0x40] sm:$0xff] }
  0x3e   :  { %538 = vmatprep.subr.mxu0 %v766_v0  ;;  %573 = vmatprep.subr.mxu1 %v766_v0  ;;  %v270_v42 = vld [vmem:[#allocation6 + $0x38] sm:$0xff]  ;;  %v269_v43 = vld [vmem:[#allocation6 + $0x30] sm:$0xff]  ;;  %v268_v44 = vld [vmem:[#allocation6 + $0x28] sm:$0xff] }
  0x3f   :  { %539 = vmatpush3.msra.mxu0 %v88_v11  ;;  %574 = vmatpush3.msra.mxu1 %v180_v16  ;;  %v267_v45 = vld [vmem:[#allocation6 + $0x20] sm:$0xff]  ;;  %v266_v46 = vld [vmem:[#allocation6 + $0x18] sm:$0xff]  ;;  %v265_v52 = vld [vmem:[#allocation6 + $0x10] sm:$0xff] }
  0x40   :  { %540 = vmatprep.subr.mxu0 %v766_v0  ;;  %575 = vmatprep.subr.mxu1 %v766_v0  ;;  %v454_v47 = vld [vmem:[%s922_s5] ss:$0 sm:$0xff]  ;;  %v264_v53 = vld [vmem:[#allocation6 + $0x8] sm:$0xff]  ;;  %v370_v55 = vld [vmem:[#allocation7 + $0x78] sm:$0xff] }
  0x41   :  { %541 = vmatpush3.msra.mxu0 %v87_v13  ;;  %576 = vmatpush3.msra.mxu1 %v179_v18  ;;  %v263_v54 = vld [vmem:[#allocation6] sm:$0xff]  ;;  %v369_v56 = vld [vmem:[#allocation7 + $0x70] sm:$0xff]  ;;  %v368_v57 = vld [vmem:[#allocation7 + $0x68] sm:$0xff] }
  0x42   :  { %542 = vmatprep.subr.mxu0 %v766_v0  ;;  %577 = vmatprep.subr.mxu1 %v766_v0  ;;  %v367_v58 = vld [vmem:[#allocation7 + $0x60] sm:$0xff]  ;;  %v366_v59 = vld [vmem:[#allocation7 + $0x58] sm:$0xff]  ;;  %v365_v60 = vld [vmem:[#allocation7 + $0x50] sm:$0xff] }
  0x43   :  { %543 = vmatpush3.msra.mxu0 %v86_v15  ;;  %578 = vmatpush3.msra.mxu1 %v178_v20  ;;  %v364_v61 = vld [vmem:[#allocation7 + $0x48] sm:$0xff]  ;;  %v363_v62 = vld [vmem:[#allocation7 + $0x40] sm:$0xff]  ;;  %v362_v63 = vld [vmem:[#allocation7 + $0x38] sm:$0xff] }
  0x44   :  { %544 = vmatprep.subr.mxu0 %v766_v0  ;;  %579 = vmatprep.subr.mxu1 %v766_v0  ;;  %v361_v1 = vld [vmem:[#allocation7 + $0x30] sm:$0xff]  ;;  %v360_v2 = vld [vmem:[#allocation7 + $0x28] sm:$0xff]  ;;  %v359_v3 = vld [vmem:[#allocation7 + $0x20] sm:$0xff] }
  0x45   :  { %545 = vmatpush3.msra.mxu0 %v85_v17  ;;  %580 = vmatpush3.msra.mxu1 %v177_v22  ;;  %v358_v4 = vld [vmem:[#allocation7 + $0x18] sm:$0xff]  ;;  %v455_v5 = vld [vmem:[%s922_s5 + $0x1] ss:$0 sm:$0xff]  ;;  %v357_v10 = vld [vmem:[#allocation7 + $0x10] sm:$0xff] }
  0x46   :  { %546 = vmatprep.subr.mxu0 %v766_v0  ;;  %581 = vmatprep.subr.mxu1 %v766_v0  ;;  %v356_v11 = vld [vmem:[#allocation7 + $0x8] sm:$0xff]  ;;  %v355_v12 = vld [vmem:[#allocation7] sm:$0xff] }
  0x47   :  { %547 = vmatpush3.msra.mxu0 %v84_v19  ;;  %582 = vmatpush3.msra.mxu1 %v176_v24  ;;  %v456_v13 = vld [vmem:[%s922_s5 + $0x2] ss:$0 sm:$0xff]  ;;  %v457_v18 = vld [vmem:[%s922_s5 + $0x3] ss:$0 sm:$0xff] }
  0x48   :  { %548 = vmatprep.subr.mxu0 %v766_v0  ;;  %583 = vmatprep.subr.mxu1 %v766_v0 }
  0x49   :  { %549 = vmatpush3.msra.mxu0 %v83_v21  ;;  %584 = vmatpush3.msra.mxu1 %v175_v26 }
  0x4a   :  { %550 = vmatprep.subr.mxu0 %v766_v0  ;;  %585 = vmatprep.subr.mxu1 %v766_v0 }
  0x4b   :  { %551 = vmatpush3.msra.mxu0 %v82_v23  ;;  %586 = vmatpush3.msra.mxu1 %v174_v28 }
  0x4c   :  { %552 = vmatprep.subr.mxu0 %v766_v0  ;;  %587 = vmatprep.subr.mxu1 %v766_v0 }
  0x4d   :  { %553 = vmatpush3.msra.mxu0 %v81_v25  ;;  %588 = vmatpush3.msra.mxu1 %v173_v31 }
  0x4e   :  { %554 = vmatprep.subr.mxu0 %v766_v0  ;;  %589 = vmatprep.subr.mxu1 %v766_v0 }
  0x4f   :  { %555 = vmatpush3.msra.mxu0 %v80_v27  ;;  %590 = vmatpush3.msra.mxu1 %v172_v32 }
  0x50   :  { %556 = vmatprep.subr.mxu0 %v766_v0  ;;  %591 = vmatprep.subr.mxu1 %v766_v0 }
  0x51   :  { %557 = vmatpush3.msra.mxu0 %v79_v29  ;;  %592 = vmatpush3.msra.mxu1 %v171_v33 }
  0x52   :  { %559 = vmatmul.mubr.f32.vlgmr.msra.gmra.mxu0 %v78_v30  ;;  %596 = vmatprep.subr.mxu0 %v766_v0 }
  0x53   :  { %628 = vmatprep.mubr.msk.f32.mxu0 %vm767_vm0, %v766_v0  ;;  %631 = vmatprep.subr.mxu1 %v766_v0 }
  0x54   :  { %597 = vmatpush3.msra.mxu0 %v278_v34 }
  0x55   :  { %598 = vmatprep.subr.mxu0 %v766_v0 }
  0x56   :  { %599 = vmatpush3.msra.mxu0 %v277_v35 }
  0x57   :  { %600 = vmatprep.subr.mxu0 %v766_v0 }
  0x58   :  { %601 = vmatpush3.msra.mxu0 %v276_v36 }
  0x59   :  { %602 = vmatprep.subr.mxu0 %v766_v0 }
  0x5a   :  { %603 = vmatpush3.msra.mxu0 %v275_v37 }
  0x5b   :  { %604 = vmatprep.subr.mxu0 %v766_v0 }
  0x5c   :  { %605 = vmatpush3.msra.mxu0 %v274_v38 }
  0x5d   :  { %606 = vmatprep.subr.mxu0 %v766_v0 }
  0x5e   :  { %607 = vmatpush3.msra.mxu0 %v273_v39 }
  0x5f   :  { %608 = vmatprep.subr.mxu0 %v766_v0 }
  0x60   :  { %609 = vmatpush3.msra.mxu0 %v272_v40 }
  0x61   :  { %610 = vmatprep.subr.mxu0 %v766_v0 }
  0x62   :  { %611 = vmatpush3.msra.mxu0 %v271_v41 }
  0x63   :  { %612 = vmatprep.subr.mxu0 %v766_v0 }
  0x64   :  { %613 = vmatpush3.msra.mxu0 %v270_v42 }
  0x65   :  { %614 = vmatprep.subr.mxu0 %v766_v0 }
  0x66   :  { %615 = vmatpush3.msra.mxu0 %v269_v43 }
  0x67   :  { %616 = vmatprep.subr.mxu0 %v766_v0 }
  0x68   :  { %617 = vmatpush3.msra.mxu0 %v268_v44 }
  0x69   :  { %618 = vmatprep.subr.mxu0 %v766_v0 }
  0x6a   :  { %619 = vmatpush3.msra.mxu0 %v267_v45 }
  0x6b   :  { %620 = vmatprep.subr.mxu0 %v766_v0 }
  0x6c   :  { %621 = vmatpush3.msra.mxu0 %v266_v46 }
  0x6d   :  { %622 = vmatprep.subr.mxu0 %v766_v0 }
  0x6e   :  { %623 = vmatpush3.msra.mxu0 %v265_v52 }
  0x6f   :  { %624 = vmatprep.subr.mxu0 %v766_v0 }
  0x70   :  { %625 = vmatpush3.msra.mxu0 %v264_v53 }
  0x71   :  { %626 = vmatprep.subr.mxu0 %v766_v0 }
  0x72   :  { %627 = vmatpush3.msra.mxu0 %v263_v54 }
 0x112   :  { %v166_v48 = vpop.f32.mrf.mxu0 }
 0x113   :  { %v167_v49 = vadd.f32 %v454_v47, %v166_v48 }
 0x114   :  { %v560_v50 = vpop.f32.mrf.mxu0 }
 0x115   :  { %v170_v51 = vmax.f32 %v167_v49, 0.0 }
 0x117   :  { %594 = vmatmul.mubr.f32.vlgmr.msra.gmra.mxu1 %v170_v51 }
 0x118   :  { %663 = vmatprep.mubr.msk.f32.mxu1 %vm767_vm0, %v766_v0  ;;  %632 = vmatpush3.msra.mxu1 %v370_v55 }
 0x119   :  { %633 = vmatprep.subr.mxu1 %v766_v0 }
 0x11a   :  { %634 = vmatpush3.msra.mxu1 %v369_v56 }
 0x11b   :  { %635 = vmatprep.subr.mxu1 %v766_v0 }
 0x11c   :  { %636 = vmatpush3.msra.mxu1 %v368_v57 }
 0x11d   :  { %637 = vmatprep.subr.mxu1 %v766_v0 }
 0x11e   :  { %638 = vmatpush3.msra.mxu1 %v367_v58 }
 0x11f   :  { %639 = vmatprep.subr.mxu1 %v766_v0 }
 0x120   :  { %640 = vmatpush3.msra.mxu1 %v366_v59 }
 0x121   :  { %641 = vmatprep.subr.mxu1 %v766_v0 }
 0x122   :  { %642 = vmatpush3.msra.mxu1 %v365_v60 }
 0x123   :  { %643 = vmatprep.subr.mxu1 %v766_v0 }
 0x124   :  { %644 = vmatpush3.msra.mxu1 %v364_v61 }
 0x125   :  { %645 = vmatprep.subr.mxu1 %v766_v0 }
 0x126   :  { %646 = vmatpush3.msra.mxu1 %v363_v62 }
 0x127   :  { %647 = vmatprep.subr.mxu1 %v766_v0 }
 0x128   :  { %648 = vmatpush3.msra.mxu1 %v362_v63 }
 0x129   :  { %649 = vmatprep.subr.mxu1 %v766_v0 }
 0x12a   :  { %650 = vmatpush3.msra.mxu1 %v361_v1 }
 0x12b   :  { %651 = vmatprep.subr.mxu1 %v766_v0 }
 0x12c   :  { %652 = vmatpush3.msra.mxu1 %v360_v2 }
 0x12d   :  { %653 = vmatprep.subr.mxu1 %v766_v0 }
 0x12e   :  { %654 = vmatpush3.msra.mxu1 %v359_v3 }
 0x12f   :  { %655 = vmatprep.subr.mxu1 %v766_v0 }
 0x130   :  { %656 = vmatpush3.msra.mxu1 %v358_v4 }
 0x131   :  { %657 = vmatprep.subr.mxu1 %v766_v0 }
 0x132   :  { %658 = vmatpush3.msra.mxu1 %v357_v10 }
 0x133   :  { %659 = vmatprep.subr.mxu1 %v766_v0 }
 0x134   :  { %660 = vmatpush3.msra.mxu1 %v356_v11 }
 0x135   :  { %661 = vmatprep.subr.mxu1 %v766_v0 }
 0x136   :  { %662 = vmatpush3.msra.mxu1 %v355_v12 }
 0x1d7   :  { %v258_v6 = vpop.f32.mrf.mxu1 }
 0x1d8   :  { %v259_v7 = vadd.f32 %v455_v5, %v258_v6 }
 0x1d9   :  { %v595_v8 = vpop.f32.mrf.mxu1 }
 0x1da   :  { %v262_v9 = vmax.f32 %v259_v7, 0.0 }
 0x1dc   :  { %629 = vmatmul.mubr.f32.vlgmr.msra.gmra.mxu0 %v262_v9 }
 0x29c   :  { %v350_v14 = vpop.f32.mrf.mxu0 }
 0x29d   :  { %v351_v15 = vadd.f32 %v456_v13, %v350_v14 }
 0x29e   :  { %v630_v16 = vpop.f32.mrf.mxu0 }
 0x29f   :  { %v354_v17 = vmax.f32 %v351_v15, 0.0 }
 0x2a1   :  { %664 = vmatmul.mubr.f32.vlgmr.msra.gmra.mxu1 %v354_v17 }
 0x361   :  { %v442_v19 = vpop.f32.mrf.mxu1 }
 0x362   :  { %v443_v20 = vadd.f32 %v457_v18, %v442_v19 }
 0x363   :  { %v665_v21 = vpop.f32.mrf.mxu1 }
 0x364   :  { %446 = vst [vmem:[%s923_s6] sm:$0xff] %v443_v20 }
 0x365   :  { %451 = vsyncpa [#allocation3], 1 }
 0x366   :  { %452 = vsyncpa [#allocation5], 1 }
 0x367   :  { %453 = vsyncpa [#allocation8], 1 }

</bundles_post_ra>
